<compile_context>
chip_gen: v7x
topology: tpu7x:2x2x1
jax: 0.10.0
libtpu: 0.0.40
codegen_flags: <defaults>
</compile_context>

<pallas_src>
import functools

import jax
import jax.numpy as jnp
from jax import lax
from jax.experimental import pallas as pl
from jax.experimental.pallas import tpu as pltpu


# ---------------------------------------------------------------------------
# Shared kernel pieces
# ---------------------------------------------------------------------------
def _init_q_and_stats(xq_ref, wq_ref, q_scr, m_scr, l_scr, acc_scr):
    # Project this query tile once; it stays resident across the kv loop.
    q = lax.dot_general(xq_ref[0], wq_ref[...],
                        (((1,), (1,)), ((), ())),
                        preferred_element_type=jnp.float32)
    q_scr[...] = q.astype(q_scr.dtype)
    m_scr[...] = jnp.full_like(m_scr, -jnp.inf)
    l_scr[...] = jnp.zeros_like(l_scr)
    acc_scr[...] = jnp.zeros_like(acc_scr)


def _online_softmax_update(q, k, v, m_scr, l_scr, acc_scr):
    # Scores q k^T without transposing k (contract feature dims).
    s = lax.dot_general(q, k, (((1,), (1,)), ((), ())),
                        preferred_element_type=jnp.float32)          # (tq, tk)
    m_prev = m_scr[...]
    m_new = jnp.maximum(m_prev, jnp.max(s, axis=-1, keepdims=True))
    alpha = jnp.exp(m_prev - m_new)
    p = jnp.exp(s - m_new)
    l_scr[...] = alpha * l_scr[...] + jnp.sum(p, axis=-1, keepdims=True)
    acc_scr[...] = alpha * acc_scr[...] + jnp.dot(
        p.astype(v.dtype), v, preferred_element_type=jnp.float32)
    m_scr[...] = m_new


def _finalize(o_ref, l_scr, acc_scr):
    inv_l = pl.reciprocal(l_scr[...], approx=True)   # EUP vrcp slot (nearly free)
    o_ref[0] = (acc_scr[...] * inv_l).astype(o_ref.dtype)


# ---------------------------------------------------------------------------
# Variant 1: K/V projected once per batch, cached in VMEM scratch.
# ---------------------------------------------------------------------------
def _flash_kernel_cached_kv(xq_ref, xkv_ref, wq_ref, wkv_ref, o_ref,
                            q_scr, kv_scr, m_scr, l_scr, acc_scr):
    qi = pl.program_id(1)
    ki = pl.program_id(2)
    d = q_scr.shape[-1]
    tk = xkv_ref.shape[1]

    @pl.when(ki == 0)
    def _init():
        _init_q_and_stats(xq_ref, wq_ref, q_scr, m_scr, l_scr, acc_scr)

    row0 = pl.multiple_of(ki * tk, tk)

    @pl.when(qi == 0)
    def _project_kv():
        # Fused K/V projection for this kv tile (single MXU push on the
        # stacked (2D, D) weight); cached for all later query tiles.
        kv_new = lax.dot_general(xkv_ref[0], wkv_ref[...],
                                 (((1,), (1,)), ((), ())),
                                 preferred_element_type=jnp.float32)
        kv_scr[pl.ds(row0, tk), :] = kv_new.astype(kv_scr.dtype)

    kv = kv_scr[pl.ds(row0, tk), :]                                  # (tk, 2D)
    _online_softmax_update(q_scr[...], kv[:, :d], kv[:, d:],
                           m_scr, l_scr, acc_scr)

    @pl.when(ki == pl.num_programs(2) - 1)
    def _done():
        _finalize(o_ref, l_scr, acc_scr)


# ---------------------------------------------------------------------------
# Variant 2: fallback — recompute K/V per (query tile, kv tile) when the KV
# cache would not fit in VMEM (very long sequences / wide features).
# ---------------------------------------------------------------------------
def _flash_kernel_recompute_kv(xq_ref, xkv_ref, wq_ref, wkv_ref, o_ref,
                               q_scr, m_scr, l_scr, acc_scr):
    ki = pl.program_id(2)
    d = q_scr.shape[-1]

    @pl.when(ki == 0)
    def _init():
        _init_q_and_stats(xq_ref, wq_ref, q_scr, m_scr, l_scr, acc_scr)

    xkv = xkv_ref[0]                                                 # (tk, D)
    kv = lax.dot_general(xkv, wkv_ref[...],
                         (((1,), (1,)), ((), ())),
                         preferred_element_type=jnp.float32).astype(xkv.dtype)
    _online_softmax_update(q_scr[...], kv[:, :d], kv[:, d:],
                           m_scr, l_scr, acc_scr)

    @pl.when(ki == pl.num_programs(2) - 1)
    def _done():
        _finalize(o_ref, l_scr, acc_scr)


# ---------------------------------------------------------------------------
# Wrapper
# ---------------------------------------------------------------------------
def _pick_tile(s, requested):
    if requested is not None:
        assert s % requested == 0, "tile must divide sequence length"
        return requested
    for cand in (512, 256, 128):
        if s % cand == 0:
            return cand
    return s  # full-extent block is always legal


_KV_CACHE_VMEM_BUDGET = 8 * 1024 * 1024  # bytes of VMEM we allow the KV cache


@functools.partial(jax.jit, static_argnames=("tq", "tk"))
def self_attention(x, wq, wk, wv, *, tq=None, tk=None):
    """x: (B, S, D); wq/wk/wv: (D, D) PyTorch Linear weights (y = x @ W^T)."""
    B, S, D = x.shape

    # Lane-dense feature dim: zero-pad D up to a multiple of 128.  Exact:
    # padded q/k/v features are identically zero, so scores and the real
    # output columns are unchanged; padded output columns are sliced off.
    Dp = ((D + 127) // 128) * 128
    if Dp != D:
        pad = Dp - D
        x = jnp.pad(x, ((0, 0), (0, 0), (0, pad)))
        wq = jnp.pad(wq, ((0, pad), (0, pad)))
        wk = jnp.pad(wk, ((0, pad), (0, pad)))
        wv = jnp.pad(wv, ((0, pad), (0, pad)))
    wkv = jnp.concatenate([wk, wv], axis=0)                          # (2*Dp, Dp)

    tq = _pick_tile(S, tq)
    tk = _pick_tile(S, tk)
    n_q, n_kv = S // tq, S // tk

    itm = x.dtype.itemsize
    cache_bytes = S * 2 * Dp * itm
    use_kv_cache = cache_bytes <= _KV_CACHE_VMEM_BUDGET

    scratch = [pltpu.VMEM((tq, Dp), x.dtype)]            # projected q tile
    if use_kv_cache:
        scratch.append(pltpu.VMEM((S, 2 * Dp), x.dtype))  # cached [K | V]
    scratch += [
        pltpu.VMEM((tq, 1), jnp.float32),                # running max
        pltpu.VMEM((tq, 1), jnp.float32),                # running denominator
        pltpu.VMEM((tq, Dp), jnp.float32),               # output accumulator
    ]

    if use_kv_cache:
        kernel = _flash_kernel_cached_kv
        # For qi > 0 the kv x-stream is unused: collapse its block index to a
        # constant so the pipeline stops re-fetching it from HBM.
        xkv_spec = pl.BlockSpec(
            (1, tk, Dp), lambda b, qi, ki: (b, jnp.where(qi == 0, ki, 0), 0))
        # KV cache is carried across query tiles -> qi axis must be serial.
        dims = ("parallel", "arbitrary", "arbitrary")
        proj_flops = 2 * B * S * 3 * Dp * Dp
    else:
        kernel = _flash_kernel_recompute_kv
        xkv_spec = pl.BlockSpec((1, tk, Dp), lambda b, qi, ki: (b, ki, 0))
        dims = ("parallel", "parallel", "arbitrary")
        proj_flops = 2 * B * S * (1 + 2 * n_q) * Dp * Dp

    # Rough VMEM need: double-buffered x/out blocks + weights + scratch.
    block_bytes = (tq * Dp + tk * Dp + tq * Dp) * itm + 3 * Dp * Dp * itm
    scratch_bytes = tq * Dp * itm + (tq * Dp + 2 * tq) * 4
    if use_kv_cache:
        scratch_bytes += cache_bytes
    vmem_limit = int(min(max(2 * 2 * block_bytes + scratch_bytes + (4 << 20),
                             32 * 1024 * 1024), 128 * 1024 * 1024))

    cost = pl.CostEstimate(
        flops=int(proj_flops + 4 * B * S * S * Dp),
        transcendentals=int(B * S * S),
        bytes_accessed=int((2 * B * S * Dp + 3 * Dp * Dp) * itm),
    )

    out = pl.pallas_call(
        kernel,
        out_shape=jax.ShapeDtypeStruct((B, S, Dp), x.dtype),
        grid_spec=pltpu.PrefetchScalarGridSpec(
            num_scalar_prefetch=0,
            grid=(B, n_q, n_kv),
            in_specs=[
                pl.BlockSpec((1, tq, Dp), lambda b, qi, ki: (b, qi, 0)),  # q rows
                xkv_spec,                                                 # k/v rows
                pl.BlockSpec((Dp, Dp), lambda b, qi, ki: (0, 0)),         # Wq
                pl.BlockSpec((2 * Dp, Dp), lambda b, qi, ki: (0, 0)),     # [Wk; Wv]
            ],
            out_specs=pl.BlockSpec((1, tq, Dp), lambda b, qi, ki: (b, qi, 0)),
            scratch_shapes=scratch,
        ),
        compiler_params=pltpu.CompilerParams(
            dimension_semantics=dims,
            vmem_limit_bytes=vmem_limit,
        ),
        cost_estimate=cost,
    )(x, x, wq, wkv)

    return out[..., :D] if Dp != D else out


def _reference(x, wq, wk, wv):
    q = jnp.einsum("bsd,ed->bse", x, wq)
    k = jnp.einsum("bsd,ed->bse", x, wk)
    v = jnp.einsum("bsd,ed->bse", x, wv)
    f = jnp.einsum("bqd,bkd->bqk", q, k)
    f = jax.nn.softmax(f, axis=-1)
    return jnp.einsum("bqk,bkd->bqd", f, v)


if __name__ == "__main__":
    key = jax.random.PRNGKey(0)

    # --- Test 1: module-sized inputs (batch=2, seq=8, dim=32), single tile ---
    B, S, D = 2, 8, 32
    kx, kq, kk, kv, key = jax.random.split(key, 5)
    x = jax.random.normal(kx, (B, S, D), dtype=jnp.float32)
    bound = 1.0 / (D ** 0.5)  # roughly PyTorch's default Linear init scale
    wq = jax.random.uniform(kq, (D, D), jnp.float32, -bound, bound)
    wk = jax.random.uniform(kk, (D, D), jnp.float32, -bound, bound)
    wv = jax.random.uniform(kv, (D, D), jnp.float32, -bound, bound)

    out = jax.block_until_ready(self_attention(x, wq, wk, wv))
    ref = _reference(x, wq, wk, wv)
    assert out.shape == (B, S, D)
    # Tolerance covers the EUP approximate reciprocal in the final 1/l rescale
    # (~1e-3 relative); everything else is f32-accumulated.
    assert jnp.allclose(out, ref, atol=2e-2, rtol=2e-2), float(
        jnp.max(jnp.abs(out - ref)))

    # --- Test 2: multi-tile path (128x128 tiles -> exercises the cached-KV
    #             scratch, online-softmax accumulation and D=64->128 padding) ---
    B2, S2, D2 = 2, 256, 64
    kx2, kq2, kk2, kv2, key = jax.random.split(key, 5)
    x2 = jax.random.normal(kx2, (B2, S2, D2), dtype=jnp.float32)
    bound2 = 1.0 / (D2 ** 0.5)
    wq2 = jax.random.uniform(kq2, (D2, D2), jnp.float32, -bound2, bound2)
    wk2 = jax.random.uniform(kk2, (D2, D2), jnp.float32, -bound2, bound2)
    wv2 = jax.random.uniform(kv2, (D2, D2), jnp.float32, -bound2, bound2)

    out2 = jax.block_until_ready(self_attention(x2, wq2, wk2, wv2, tq=128, tk=128))
    ref2 = _reference(x2, wq2, wk2, wv2)
    assert out2.shape == (B2, S2, D2)
    assert jnp.allclose(out2, ref2, atol=2e-2, rtol=2e-2), float(
        jnp.max(jnp.abs(out2 - ref2)))

    print("KERNEL_OK")
</pallas_src>

<mosaic_0001>
module attributes {stable_mosaic.version = 11 : i64} {
  func.func @_flash_kernel_cached_kv(%arg0: i32, %arg1: i32, %arg2: i32, %arg3: memref<1x8x128xf32, #tpu.memory_space<vmem>>, %arg4: memref<1x8x128xf32, #tpu.memory_space<vmem>>, %arg5: memref<128x128xf32, #tpu.memory_space<vmem>>, %arg6: memref<256x128xf32, #tpu.memory_space<vmem>>, %arg7: memref<1x8x128xf32, #tpu.memory_space<vmem>>, %arg8: memref<8x128xf32, #tpu.memory_space<vmem>>, %arg9: memref<8x256xf32, #tpu.memory_space<vmem>>, %arg10: memref<8x1xf32, #tpu.memory_space<vmem>>, %arg11: memref<8x1xf32, #tpu.memory_space<vmem>>, %arg12: memref<8x128xf32, #tpu.memory_space<vmem>>) attributes {dimension_semantics = [#tpu.dimension_semantics<parallel>, #tpu.dimension_semantics<arbitrary>, #tpu.dimension_semantics<arbitrary>], iteration_bounds = array<i64: 2, 1, 1>, scalar_prefetch = 0 : i64, scratch_operands = 5 : i64, tpu.core_type = #tpu.core_type<tc>, window_params = [{transform_indices = @transform_0, window_bounds = array<i64: 1, 8, 128>}, {transform_indices = @transform_1, window_bounds = array<i64: 1, 8, 128>}, {pipeline_mode = #tpu.pipeline_mode<synchronous>, transform_indices = @transform_2, window_bounds = array<i64: 128, 128>}, {pipeline_mode = #tpu.pipeline_mode<synchronous>, transform_indices = @transform_3, window_bounds = array<i64: 256, 128>}, {transform_indices = @transform_4, window_bounds = array<i64: 1, 8, 128>}]} {
    %c0_i32 = arith.constant 0 : i32
    %0 = arith.cmpi eq, %arg2, %c0_i32 : i32
    %1 = arith.extui %0 : i1 to i32
    %c0_i32_0 = arith.constant 0 : i32
    %2 = arith.cmpi ne, %1, %c0_i32_0 : i32
    scf.if %2 {
      %c0_22 = arith.constant 0 : index
      %c0_23 = arith.constant 0 : index
      %c0_24 = arith.constant 0 : index
      %39 = vector.load %arg3[%c0_22, %c0_23, %c0_24] : memref<1x8x128xf32, #tpu.memory_space<vmem>>, vector<1x8x128xf32>
      %40 = vector.shape_cast %39 : vector<1x8x128xf32> to vector<8x128xf32>
      %c0_25 = arith.constant 0 : index
      %c0_26 = arith.constant 0 : index
      %41 = vector.load %arg5[%c0_25, %c0_26] : memref<128x128xf32, #tpu.memory_space<vmem>>, vector<128x128xf32>
      %cst_27 = arith.constant dense<0.000000e+00> : vector<8x128xf32>
      %42 = tpu.matmul %40, %41, %cst_27 {dimension_numbers = #tpu.dot_dimension_numbers<[1], [1], [0], [0], [0, 0, 1, 0], [], []>} : vector<8x128xf32>, vector<128x128xf32>, vector<8x128xf32> -> vector<8x128xf32>
      %c0_28 = arith.constant 0 : index
      %c0_29 = arith.constant 0 : index
      %43 = vector.load %arg8[%c0_28, %c0_29] : memref<8x128xf32, #tpu.memory_space<vmem>>, vector<8x128xf32>
      tpu.vector_store %arg8[%c0_28, %c0_29], %42 {strides = array<i32>} : memref<8x128xf32, #tpu.memory_space<vmem>>, vector<8x128xf32>,
      %cst_30 = arith.constant 0xFF800000 : f32
      %44 = vector.broadcast %cst_30 : f32 to vector<8x1xf32>
      %c0_31 = arith.constant 0 : index
      %c0_32 = arith.constant 0 : index
      %45 = vector.load %arg10[%c0_31, %c0_32] : memref<8x1xf32, #tpu.memory_space<vmem>>, vector<8x1xf32>
      tpu.vector_store %arg10[%c0_31, %c0_32], %44 {strides = array<i32>} : memref<8x1xf32, #tpu.memory_space<vmem>>, vector<8x1xf32>,
      %cst_33 = arith.constant 0.000000e+00 : f32
      %46 = vector.broadcast %cst_33 : f32 to vector<8x1xf32>
      %c0_34 = arith.constant 0 : index
      %c0_35 = arith.constant 0 : index
      %47 = vector.load %arg11[%c0_34, %c0_35] : memref<8x1xf32, #tpu.memory_space<vmem>>, vector<8x1xf32>
      tpu.vector_store %arg11[%c0_34, %c0_35], %46 {strides = array<i32>} : memref<8x1xf32, #tpu.memory_space<vmem>>, vector<8x1xf32>,
      %cst_36 = arith.constant 0.000000e+00 : f32
      %48 = vector.broadcast %cst_36 : f32 to vector<8x128xf32>
      %c0_37 = arith.constant 0 : index
      %c0_38 = arith.constant 0 : index
      %49 = vector.load %arg12[%c0_37, %c0_38] : memref<8x128xf32, #tpu.memory_space<vmem>>, vector<8x128xf32>
      tpu.vector_store %arg12[%c0_37, %c0_38], %48 {strides = array<i32>} : memref<8x128xf32, #tpu.memory_space<vmem>>, vector<8x128xf32>,
    } else {
    }
    %c8_i32 = arith.constant 8 : i32
    %3 = arith.muli %arg2, %c8_i32 : i32
    %4 = tpu.assume_multiple %3, 8 : i32
    %c0_i32_1 = arith.constant 0 : i32
    %5 = arith.cmpi eq, %arg1, %c0_i32_1 : i32
    %6 = arith.extui %5 : i1 to i32
    %c0_i32_2 = arith.constant 0 : i32
    %7 = arith.cmpi ne, %6, %c0_i32_2 : i32
    scf.if %7 {
      %c0_22 = arith.constant 0 : index
      %c0_23 = arith.constant 0 : index
      %c0_24 = arith.constant 0 : index
      %39 = vector.load %arg4[%c0_22, %c0_23, %c0_24] : memref<1x8x128xf32, #tpu.memory_space<vmem>>, vector<1x8x128xf32>
      %40 = vector.shape_cast %39 : vector<1x8x128xf32> to vector<8x128xf32>
      %c0_25 = arith.constant 0 : index
      %c0_26 = arith.constant 0 : index
      %41 = vector.load %arg6[%c0_25, %c0_26] : memref<256x128xf32, #tpu.memory_space<vmem>>, vector<256x128xf32>
      %cst_27 = arith.constant dense<0.000000e+00> : vector<8x256xf32>
      %42 = tpu.matmul %40, %41, %cst_27 {dimension_numbers = #tpu.dot_dimension_numbers<[1], [1], [0], [0], [0, 0, 1, 0], [], []>} : vector<8x128xf32>, vector<256x128xf32>, vector<8x256xf32> -> vector<8x256xf32>
      %43 = arith.index_cast %4 : i32 to index
      %c0_28 = arith.constant 0 : index
      %44 = vector.load %arg9[%43, %c0_28] : memref<8x256xf32, #tpu.memory_space<vmem>>, vector<8x256xf32>
      tpu.vector_store %arg9[%43, %c0_28], %42 {strides = array<i32>} : memref<8x256xf32, #tpu.memory_space<vmem>>, vector<8x256xf32>,
    } else {
    }
    %8 = arith.index_cast %4 : i32 to index
    %c0 = arith.constant 0 : index
    %9 = vector.load %arg9[%8, %c0] : memref<8x256xf32, #tpu.memory_space<vmem>>, vector<8x256xf32>
    %c0_3 = arith.constant 0 : index
    %c0_4 = arith.constant 0 : index
    %10 = vector.load %arg8[%c0_3, %c0_4] : memref<8x128xf32, #tpu.memory_space<vmem>>, vector<8x128xf32>
    %11 = vector.extract_strided_slice %9 {offsets = [0, 0], sizes = [8, 128], strides = [1, 1]} : vector<8x256xf32> to vector<8x128xf32>
    %12 = vector.extract_strided_slice %9 {offsets = [0, 128], sizes = [8, 128], strides = [1, 1]} : vector<8x256xf32> to vector<8x128xf32>
    %cst = arith.constant dense<0.000000e+00> : vector<8x8xf32>
    %13 = tpu.matmul %10, %11, %cst {dimension_numbers = #tpu.dot_dimension_numbers<[1], [1], [0], [0], [0, 0, 1, 0], [], []>} : vector<8x128xf32>, vector<8x128xf32>, vector<8x8xf32> -> vector<8x8xf32>
    %c0_5 = arith.constant 0 : index
    %c0_6 = arith.constant 0 : index
    %14 = vector.load %arg10[%c0_5, %c0_6] : memref<8x1xf32, #tpu.memory_space<vmem>>, vector<8x1xf32>
    %cst_7 = arith.constant dense<0xFF800000> : vector<8xf32>
    %15 = vector.multi_reduction <maximumf>, %13, %cst_7 [1] : vector<8x8xf32> to vector<8xf32>
    %16 = vector.shape_cast %15 : vector<8xf32> to vector<8x1xf32>
    %17 = arith.maximumf %14, %16 : vector<8x1xf32>
    %18 = arith.subf %14, %17 : vector<8x1xf32>
    %19 = math.exp %18 : vector<8x1xf32>
    %20 = vector.broadcast %17 : vector<8x1xf32> to vector<8x8xf32>
    %21 = arith.subf %13, %20 : vector<8x8xf32>
    %22 = math.exp %21 : vector<8x8xf32>
    %c0_8 = arith.constant 0 : index
    %c0_9 = arith.constant 0 : index
    %23 = vector.load %arg11[%c0_8, %c0_9] : memref<8x1xf32, #tpu.memory_space<vmem>>, vector<8x1xf32>
    %24 = arith.mulf %19, %23 : vector<8x1xf32>
    %cst_10 = arith.constant dense<0.000000e+00> : vector<8xf32>
    %25 = vector.multi_reduction <add>, %22, %cst_10 [1] : vector<8x8xf32> to vector<8xf32>
    %26 = vector.shape_cast %25 : vector<8xf32> to vector<8x1xf32>
    %27 = arith.addf %24, %26 : vector<8x1xf32>
    %c0_11 = arith.constant 0 : index
    %c0_12 = arith.constant 0 : index
    %28 = vector.load %arg11[%c0_11, %c0_12] : memref<8x1xf32, #tpu.memory_space<vmem>>, vector<8x1xf32>
    tpu.vector_store %arg11[%c0_11, %c0_12], %27 {strides = array<i32>} : memref<8x1xf32, #tpu.memory_space<vmem>>, vector<8x1xf32>,
    %c0_13 = arith.constant 0 : index
    %c0_14 = arith.constant 0 : index
    %29 = vector.load %arg12[%c0_13, %c0_14] : memref<8x128xf32, #tpu.memory_space<vmem>>, vector<8x128xf32>
    %30 = vector.broadcast %19 : vector<8x1xf32> to vector<8x128xf32>
    %31 = arith.mulf %30, %29 : vector<8x128xf32>
    %cst_15 = arith.constant dense<0.000000e+00> : vector<8x128xf32>
    %32 = tpu.matmul %22, %12, %cst_15 {dimension_numbers = #tpu.dot_dimension_numbers<[1], [0], [0], [1], [0, 0, 1, 1], [], []>} : vector<8x8xf32>, vector<8x128xf32>, vector<8x128xf32> -> vector<8x128xf32>
    %33 = arith.addf %31, %32 : vector<8x128xf32>
    %c0_16 = arith.constant 0 : index
    %c0_17 = arith.constant 0 : index
    %34 = vector.load %arg12[%c0_16, %c0_17] : memref<8x128xf32, #tpu.memory_space<vmem>>, vector<8x128xf32>
    tpu.vector_store %arg12[%c0_16, %c0_17], %33 {strides = array<i32>} : memref<8x128xf32, #tpu.memory_space<vmem>>, vector<8x128xf32>,
    %c0_18 = arith.constant 0 : index
    %c0_19 = arith.constant 0 : index
    %35 = vector.load %arg10[%c0_18, %c0_19] : memref<8x1xf32, #tpu.memory_space<vmem>>, vector<8x1xf32>
    tpu.vector_store %arg10[%c0_18, %c0_19], %17 {strides = array<i32>} : memref<8x1xf32, #tpu.memory_space<vmem>>, vector<8x1xf32>,
    %c0_i32_20 = arith.constant 0 : i32
    %36 = arith.cmpi eq, %arg2, %c0_i32_20 : i32
    %37 = arith.extui %36 : i1 to i32
    %c0_i32_21 = arith.constant 0 : i32
    %38 = arith.cmpi ne, %37, %c0_i32_21 : i32
    scf.if %38 {
      %c0_22 = arith.constant 0 : index
      %c0_23 = arith.constant 0 : index
      %39 = vector.load %arg11[%c0_22, %c0_23] : memref<8x1xf32, #tpu.memory_space<vmem>>, vector<8x1xf32>
      %40 = tpu.reciprocal %39 {approx = true} : vector<8x1xf32> -> vector<8x1xf32>
      %c0_24 = arith.constant 0 : index
      %c0_25 = arith.constant 0 : index
      %41 = vector.load %arg12[%c0_24, %c0_25] : memref<8x128xf32, #tpu.memory_space<vmem>>, vector<8x128xf32>
      %42 = vector.broadcast %40 : vector<8x1xf32> to vector<8x128xf32>
      %43 = arith.mulf %41, %42 : vector<8x128xf32>
      %c0_26 = arith.constant 0 : index
      %c0_27 = arith.constant 0 : index
      %c0_28 = arith.constant 0 : index
      %44 = vector.load %arg7[%c0_26, %c0_27, %c0_28] : memref<1x8x128xf32, #tpu.memory_space<vmem>>, vector<1x8x128xf32>
      %45 = vector.shape_cast %44 : vector<1x8x128xf32> to vector<8x128xf32>
      %46 = vector.shape_cast %43 : vector<8x128xf32> to vector<1x8x128xf32>
      tpu.vector_store %arg7[%c0_26, %c0_27, %c0_28], %46 {strides = array<i32>} : memref<1x8x128xf32, #tpu.memory_space<vmem>>, vector<1x8x128xf32>,
    } else {
    }
    return
  }
  func.func @transform_0(%arg0: i32, %arg1: i32, %arg2: i32) -> (i32, i32, i32) {
    %c0_i32 = arith.constant 0 : i32
    %c0_i32_0 = arith.constant 0 : i32
    return %arg0, %arg1, %c0_i32 : i32, i32, i32
  }
  func.func @transform_1(%arg0: i32, %arg1: i32, %arg2: i32) -> (i32, i32, i32) {
    %c0_i32 = arith.constant 0 : i32
    %0 = arith.cmpi eq, %arg1, %c0_i32 : i32
    %c0_i32_0 = arith.constant 0 : i32
    %1 = arith.select %0, %arg2, %c0_i32_0 : i32
    %c0_i32_1 = arith.constant 0 : i32
    %c0_i32_2 = arith.constant 0 : i32
    return %arg0, %1, %c0_i32_1 : i32, i32, i32
  }
  func.func @transform_2(%arg0: i32, %arg1: i32, %arg2: i32) -> (i32, i32) {
    %c0_i32 = arith.constant 0 : i32
    %c0_i32_0 = arith.constant 0 : i32
    %c0_i32_1 = arith.constant 0 : i32
    return %c0_i32, %c0_i32_0 : i32, i32
  }
  func.func @transform_3(%arg0: i32, %arg1: i32, %arg2: i32) -> (i32, i32) {
    %c0_i32 = arith.constant 0 : i32
    %c0_i32_0 = arith.constant 0 : i32
    %c0_i32_1 = arith.constant 0 : i32
    return %c0_i32, %c0_i32_0 : i32, i32
  }
  func.func @transform_4(%arg0: i32, %arg1: i32, %arg2: i32) -> (i32, i32, i32) {
    %c0_i32 = arith.constant 0 : i32
    %c0_i32_0 = arith.constant 0 : i32
    return %arg0, %arg1, %c0_i32 : i32, i32, i32
  }
}

</mosaic_0001>

<bundles_post_ra>
// kernel: self_attention.1
= control target key start
LH: loop header
LB: loop body
LE: loop exit
PB: predicated region body
PF: predicated region fallthrough
CT: control target
= control target key end

     0   :  { %9 = vsyncpa [#allocation8], 0  ;;  %s1430_s0 = inlined_call_operand.vmem [shape: f32[2,8,128], index: 0, kind: input, shape index: {}, may-alias: {0,1}]   ;;  %s1431_s1 = inlined_call_operand.vmem [shape: f32[2,8,128], index: 1, kind: input, shape index: {}, may-alias: {0,1}]   ;;  %s1432_s2 = inlined_call_operand.vmem [shape: f32[128,128], index: 2, kind: input, shape index: {}]   ;;  %s1433_s3 = inlined_call_operand.vmem [shape: f32[256,128], index: 3, kind: input, shape index: {}]   ;;  %s1434_s4 = inlined_call_operand.hbm [shape: f32[2,8,128], index: 4, kind: output, shape index: {}]  }
   0x1   :  { %11 = vsyncpa [#allocation8 + $0x1], 0  ;;  %s1134_s15 = smov 0   ;;  %s1136_s16 = smov 0  }
   0x2   :  { %s1138_s17 = smov 0   ;;  %s1140_s18 = smov 0  }
   0x3   :  { %s1142_s19 = smov 0   ;;  %s1144_s20 = smov 0  }
   0x4 LB: > { %s786_s21 = sadd.s32 4294967295, %s1101_s20   ;;  %s787_s22 = sadd.s32 4294967294, %s1101_s20   ;;  %s1101_s20 = sphi %s1144_s20, %s17_s20   ;;  %s1097_s19 = sphi %s1142_s19, %s1441_s19   ;;  %s1093_s18 = sphi %s1140_s18, %s1440_s18   ;;  %s1089_s17 = sphi %s1138_s17, %s1439_s17   ;;  %s1085_s16 = sphi %s1136_s16, %s1438_s16   ;;  %s1081_s15 = sphi %s1134_s15, %s1437_s15  }
   0x5   : > { %s36_s23 = sadd.s32 1, %s1097_s19  ;;  %s147_s24 = sadd.s32 1, %s1089_s17 }
   0x6   : > { %p38_p0 = scmp.ge.s32.totalorder %s36_s23, 2  ;;  %p157_p1 = scmp.ne.s32.totalorder %s1089_s17, %s1085_s16 }
   0x7   : > { %p158_p2 = scmp.eq.s32.totalorder %s786_s21, 1  ;;  %p163_p3 = scmp.ne.s32.totalorder %s1085_s16, %s1081_s15 }
   0x8   : > { %s1443_s23 = smov (%p38_p0, %s36_s23), 0  ;;  %p164_p5 = scmp.eq.s32.totalorder %s787_s22, 1 }
   0x9   : > { %p1174_p4 = por %p158_p2, %p157_p1  ;;  %s142_s26 = ssub.s32 %s1097_s19, %s1443_s23 }
   0xa   : > { %p790_p6 = scmp.ge.s32.totalorder %s1101_s20, 1  ;;  %p145_p7 = scmp.eq.s32.totalorder %s142_s26, 0 }
   0xb   : > { %p1181_p8 = por %p164_p5, %p163_p3  ;;  %p212_p9 = scmp.lt.s32.totalorder %s1101_s20, 3 }
   0xc   : > { %s1187_s28 = scalar_select %p145_p7, %s1089_s17, %s147_s24  }
   0xd   : > { %p213_p10 = pnand %p790_p6, %p212_p9 }
   0xe   : > { %v385_v0 = vld [vmem:[%s1433_s3 + $0x80] sm:$0xff] (!%p213_p10)  ;;  %v386_v1 = vld [vmem:[%s1433_s3 + $0x88] sm:$0xff] (!%p213_p10)  ;;  %v1103_v5 = vmov (!%p213_p10), 0.0|0.0   ;;  %v387_v10 = vld [vmem:[%s1433_s3 + $0x90] sm:$0xff] (!%p213_p10)  ;;  %p249_p11 = scmp.lt.s32.totalorder (!%p213_p10), %s1093_s18, 1  ;;  %vm1104_vm0 = vmmov (!%p213_p10), 0  }
   0xf   : > { %216 = sbr.rel (%p213_p10) target bundleno = 1104 (0x450), region = 36  ;;  %v369_v2 = vld [vmem:[%s1433_s3] sm:$0xff] (!%p213_p10)  ;;  %v923_v3 = vpack.c.bf16 (!%p213_p10), %v386_v1, %v385_v0  ;;  %v370_v4 = vld [vmem:[%s1433_s3 + $0x8] sm:$0xff] (!%p213_p10)  ;;  %899 = vmatprep.subr.bf16.mxu0 (!%p213_p10), %v1103_v5  ;;  %v388_v11 = vld [vmem:[%s1433_s3 + $0x98] sm:$0xff] (!%p213_p10)  ;;  %v1105_v12 = vmov (!%p213_p10), 0.0   ;;  %vm359_vm1 = vcmask (!%p213_p10), 7168  }
  0x10   : > { %v272_v6 = vld [vmem:[%s1432_s2] sm:$0xff] (!%p213_p10)  ;;  %v273_v7 = vld [vmem:[%s1432_s2 + $0x8] sm:$0xff] (!%p213_p10)  ;;  %v925_v8 = vpack.c.bf16 (!%p213_p10), %v370_v4, %v369_v2  ;;  %886 = vmatprep.mubr.msk.f32.mxu0 (!%p213_p10), %vm1104_vm0, %v1105_v12  ;;  %v927_v13 = vpack.c.bf16 (!%p213_p10), %v388_v11, %v387_v10  ;;  %v371_v14 = vld [vmem:[%s1433_s3 + $0x10] sm:$0xff] (!%p213_p10)  ;;  %361 = vst.msk [vmem:[#allocation5] sm:$0xff] (!%p213_p10), %vm359_vm1, %v1105_v12  ;;  %vm558_vm2 = vcmask (!%p213_p10), 64512   ;;  %s796_s5 = sshll.u32 (!%p213_p10), %s1093_s18, 7 }
  0x11   : > { %v900_v9 = vpack.c.bf16 (!%p213_p10), %v273_v7, %v272_v6  ;;  %924 = vmatprep.subr.bf16.mxu1 (!%p213_p10), %v923_v3  ;;  %v372_v15 = vld [vmem:[%s1433_s3 + $0x18] sm:$0xff] (!%p213_p10)  ;;  %v274_v16 = vld [vmem:[%s1432_s2 + $0x10] sm:$0xff] (!%p213_p10)  ;;  %v389_v18 = vld [vmem:[%s1433_s3 + $0xa0] sm:$0xff] (!%p213_p10)  ;;  %s1383_s10 = scalar_lea.hbm (!%p213_p10), %s1434_s4, %s796_s5 }
  0x12   : > { %926 = vmatpush3.bf16.xpose.msra.mxu1 (!%p213_p10), %v925_v8  ;;  %v275_v17 = vld [vmem:[%s1432_s2 + $0x18] sm:$0xff] (!%p213_p10)  ;;  %v390_v19 = vld [vmem:[%s1433_s3 + $0xa8] sm:$0xff] (!%p213_p10)  ;;  %v929_v20 = vpack.c.bf16 (!%p213_p10), %v372_v15, %v371_v14  ;;  %v373_v23 = vld [vmem:[%s1433_s3 + $0x20] sm:$0xff] (!%p213_p10) }
  0x13   : > { %901 = vmatpush3.bf16.xpose.msra.mxu0 (!%p213_p10), %v900_v9  ;;  %928 = vmatprep.subr.bf16.mxu1 (!%p213_p10), %v927_v13  ;;  %v903_v21 = vpack.c.bf16 (!%p213_p10), %v275_v17, %v274_v16  ;;  %v931_v22 = vpack.c.bf16 (!%p213_p10), %v390_v19, %v389_v18  ;;  %v374_v24 = vld [vmem:[%s1433_s3 + $0x28] sm:$0xff] (!%p213_p10)  ;;  %v276_v25 = vld [vmem:[%s1432_s2 + $0x20] sm:$0xff] (!%p213_p10)  ;;  %v391_v27 = vld [vmem:[%s1433_s3 + $0xb0] sm:$0xff] (!%p213_p10)  ;;  %v1106_v17 = vmov (!%p213_p10), -inf  }
  0x14   : > { %902 = vmatprep.subr.bf16.mxu0 (!%p213_p10), %v1103_v5  ;;  %v277_v26 = vld [vmem:[%s1432_s2 + $0x28] sm:$0xff] (!%p213_p10)  ;;  %v392_v28 = vld [vmem:[%s1433_s3 + $0xb8] sm:$0xff] (!%p213_p10)  ;;  %v933_v29 = vpack.c.bf16 (!%p213_p10), %v374_v24, %v373_v23  ;;  %v375_v33 = vld [vmem:[%s1433_s3 + $0x30] sm:$0xff] (!%p213_p10)  ;;  %360 = vst.msk [vmem:[#allocation4] sm:$0xff] (!%p213_p10), %vm359_vm1, %v1106_v17 }
  0x15   : > { %v906_v30 = vpack.c.bf16 (!%p213_p10), %v277_v26, %v276_v25  ;;  %v935_v32 = vpack.c.bf16 (!%p213_p10), %v392_v28, %v391_v27  ;;  %v376_v34 = vld [vmem:[%s1433_s3 + $0x38] sm:$0xff] (!%p213_p10)  ;;  %v278_v35 = vld [vmem:[%s1432_s2 + $0x30] sm:$0xff] (!%p213_p10)  ;;  %v393_v37 = vld [vmem:[%s1433_s3 + $0xc0] sm:$0xff] (!%p213_p10) }
  0x16   : > { %s1239_s21 = scalar_select %p249_p11, %s1093_s18, 1  ;;  %v279_v36 = vld [vmem:[%s1432_s2 + $0x38] sm:$0xff]  ;;  %v394_v38 = vld [vmem:[%s1433_s3 + $0xc8] sm:$0xff]  ;;  %v937_v39 = vpack.c.bf16 %v376_v34, %v375_v33  ;;  %v377_v42 = vld [vmem:[%s1433_s3 + $0x40] sm:$0xff] }
  0x17   : > { %v909_v40 = vpack.c.bf16 %v279_v36, %v278_v35  ;;  %v939_v41 = vpack.c.bf16 %v394_v38, %v393_v37  ;;  %v378_v43 = vld [vmem:[%s1433_s3 + $0x48] sm:$0xff]  ;;  %v280_v44 = vld [vmem:[%s1432_s2 + $0x40] sm:$0xff]  ;;  %v395_v46 = vld [vmem:[%s1433_s3 + $0xd0] sm:$0xff]  ;;  %s1108_s18 = smov [#allocation7]  }
  0x18   : > { %s792_s22 = sshll.u32 %s1239_s21, 3  ;;  %v281_v45 = vld [vmem:[%s1432_s2 + $0x48] sm:$0xff]  ;;  %v396_v47 = vld [vmem:[%s1433_s3 + $0xd8] sm:$0xff]  ;;  %v941_v48 = vpack.c.bf16 %v378_v43, %v377_v42  ;;  %v379_v51 = vld [vmem:[%s1433_s3 + $0x50] sm:$0xff]  ;;  %s246_s21 = sand.u32 1, %s1085_s16  }
  0x19   : > { %s264_s11 = scalar_lea.vmem %s1431_s1, %s792_s22  ;;  %v912_v49 = vpack.c.bf16 %v281_v45, %v280_v44  ;;  %v943_v50 = vpack.c.bf16 %v396_v47, %v395_v46  ;;  %v380_v52 = vld [vmem:[%s1433_s3 + $0x58] sm:$0xff]  ;;  %v282_v53 = vld [vmem:[%s1432_s2 + $0x50] sm:$0xff]  ;;  %v397_v55 = vld [vmem:[%s1433_s3 + $0xe0] sm:$0xff]  ;;  %s255_s30 = scalar_lea.vmem %s1430_s0, %s792_s22 }
  0x1a   : > { %930 = vmatpush3.bf16.xpose.msra.mxu1 %v929_v20  ;;  %v1266_v31 = vld [vmem:[%s264_s11] sm:$0xff]  ;;  %v283_v54 = vld [vmem:[%s1432_s2 + $0x58] sm:$0xff]  ;;  %v398_v56 = vld [vmem:[%s1433_s3 + $0xe8] sm:$0xff]  ;;  %v945_v57 = vpack.c.bf16 %v380_v52, %v379_v51  ;;  %s791_s22 = sshll.u32 %s246_s21, 3  ;;  %s679_s11 = scalar_lea.sflag [#allocation8], %s246_s21 }
  0x1b   : > { %904 = vmatpush3.bf16.xpose.msra.mxu0 %v903_v21  ;;  %932 = vmatprep.subr.bf16.mxu1 %v931_v22  ;;  %v915_v58 = vpack.c.bf16 %v283_v54, %v282_v53  ;;  %v947_v59 = vpack.c.bf16 %v398_v56, %v397_v55  ;;  %v381_v60 = vld [vmem:[%s1433_s3 + $0x60] sm:$0xff]  ;;  %v382_v61 = vld [vmem:[%s1433_s3 + $0x68] sm:$0xff]  ;;  %v399_v0 = vld [vmem:[%s1433_s3 + $0xf0] sm:$0xff]  ;;  %v1107_v21 = vmov 0   ;;  %s248_s6 = scalar_lea.vmem [#allocation7], %s791_s22  ;;  %s1027_s13 = sshll.u32 %s1108_s18, 4  ;;  %s1028_s13 = int_to_ptr.vmem [resolvable:$false] %s1027_s13 }
  0x1c   : > { %905 = vmatprep.subr.bf16.mxu0 %v1103_v5  ;;  %848 = vmatprep.mubr.f32.mxu1 %v1266_v31  ;;  %v284_v62 = vld [vmem:[%s1432_s2 + $0x60] sm:$0xff]  ;;  %v285_v63 = vld [vmem:[%s1432_s2 + $0x68] sm:$0xff]  ;;  %v400_v1 = vld [vmem:[%s1433_s3 + $0xf8] sm:$0xff]  ;;  %v949_v2 = vpack.c.bf16 %v382_v61, %v381_v60  ;;  %s693_s7 = sshll.u32 %s248_s6, 4  ;;  %s1029_s14 = scalar_lea.vmem %s1028_s13, 256  ;;  %s1385_s7 = int_to_ptr.vmem [resolvable:$true] %s693_s7 }
  0x1d   : > { %v918_v3 = vpack.c.bf16 %v285_v63, %v284_v62  ;;  %v951_v4 = vpack.c.bf16 %v400_v1, %v399_v0  ;;  %v383_v6 = vld [vmem:[%s1433_s3 + $0x70] sm:$0xff]  ;;  %v384_v7 = vld [vmem:[%s1433_s3 + $0x78] sm:$0xff]  ;;  %1015 = vset.pattern.permute.xlu0 %v1107_v21  ;;  %1016 = vset.pattern.permute.xlu1 %v1107_v21  ;;  %v557_v22 = vld [vmem:[#allocation4] sm:$0xff]  ;;  %s1023_s12 = scalar_lea.vmem %s1385_s7, 128  ;;  %p1030_p1 = scmp.lt.s32.totalorder %s1385_s7, %s1028_s13 }
  0x1e   : > { %v286_v8 = vld [vmem:[%s1432_s2 + $0x70] sm:$0xff]  ;;  %v287_v9 = vld [vmem:[%s1432_s2 + $0x78] sm:$0xff]  ;;  %v953_v10 = vpack.c.bf16 %v384_v7, %v383_v6  ;;  %p1024_p12 = scmp.ne.s32.totalorder %s1385_s7, %s1023_s12  ;;  %p1031_p2 = scmp.lt.s32.totalorder %s1029_s14, %s1023_s12 }
  0x1f   : > { %v921_v11 = vpack.c.bf16 %v287_v9, %v286_v8 }
  0x20   : > { %p1025_p13 = pnand %p1024_p12, %p1174_p4  ;;  %p1032_p3 = por %p1031_p2, %p1030_p1 }
  0x22   : > { %934 = vmatpush3.bf16.xpose.msra.mxu1 %v933_v29  ;;  %p1026_p0 = pneg %p1025_p13 }
  0x23   : > { %907 = vmatpush3.bf16.xpose.msra.mxu0 %v906_v30  ;;  %936 = vmatprep.subr.bf16.mxu1 %v935_v32  ;;  %v574_v32 = vld [vmem:[#allocation5] sm:$0xff] }
  0x24   : > { %908 = vmatprep.subr.bf16.mxu0 %v1103_v5  ;;  %p1033_p5 = pnand %p1032_p3, %p1026_p0 }
  0x2a   : > { %938 = vmatpush3.bf16.xpose.msra.mxu1 %v937_v39 }
  0x2b   : > { %910 = vmatpush3.bf16.xpose.msra.mxu0 %v909_v40  ;;  %940 = vmatprep.subr.bf16.mxu1 %v939_v41 }
  0x2c   : > { %911 = vmatprep.subr.bf16.mxu0 %v1103_v5 }
  0x32   : > { %942 = vmatpush3.bf16.xpose.msra.mxu1 %v941_v48 }
  0x33   : > { %913 = vmatpush3.bf16.xpose.msra.mxu0 %v912_v49  ;;  %944 = vmatprep.subr.bf16.mxu1 %v943_v50 }
  0x34   : > { %914 = vmatprep.subr.bf16.mxu0 %v1103_v5 }
  0x3a   : > { %946 = vmatpush3.bf16.xpose.msra.mxu1 %v945_v57 }
  0x3b   : > { %916 = vmatpush3.bf16.xpose.msra.mxu0 %v915_v58  ;;  %948 = vmatprep.subr.bf16.mxu1 %v947_v59 }
  0x3c   : > { %917 = vmatprep.subr.bf16.mxu0 %v1103_v5 }
  0x42   : > { %950 = vmatpush3.bf16.xpose.msra.mxu1 %v949_v2 }
  0x43   : > { %919 = vmatpush3.bf16.xpose.msra.mxu0 %v918_v3  ;;  %952 = vmatprep.subr.bf16.mxu1 %v951_v4 }
  0x44   : > { %920 = vmatprep.subr.bf16.mxu0 %v1103_v5  ;;  %v271_v5 = vld [vmem:[%s255_s30] sm:$0xff] }
  0x4a   : > { %954 = vmatpush3.bf16.xpose.msra.mxu1 %v953_v10 }
  0x4b   : > { %922 = vmatpush3.bf16.xpose.msra.mxu0 %v921_v11  ;;  %894 = vmatprep.subr.mxu1 %v1105_v12 }
  0x4c   : > { %889 = vmatprep.subr.mxu0 %v1105_v12 }
  0x51   : > { %849 = vmatmul.mubr.f32.vlgmr.msra.gmra.mrb[0].mxu1 %v1266_v31 }
  0x52   : > { %887 = vmatmul.mubr.f32.vlgmr.msra.gmra.mrb[0].mxu0 %v271_v5  ;;  %896 = vmatprep.mubr.msk.f32.mxu1 %vm1104_vm0, %v1105_v12 }
  0x53   : > { %891 = vmatprep.mubr.msk.f32.mxu0 %vm1104_vm0, %v1105_v12 }
 0x124   : > { %v467_v13 = vpop.f32.mrb[0].mxu1 }
 0x125   : > { %v354_v14 = vpop.f32.mrb[0].mxu0  ;;  %v469_v15 = vpop.f32.mrb[1].mxu1  ;;  %890 = vmatpush3.xpose.msra.mxu0 %v467_v13 }
 0x126   : > { %v888_v16 = vpop.f32.mrb[1].mxu0  ;;  %895 = vmatpush3.msra.mxu1 %v469_v15 }
 0x128   : > { %892 = vmatmul.mubr.f32.vlgmr.msra.gmra.mrb[2].mxu0 %v354_v14 }
 0x1fb   : > { %v553_v18 = vpop.f32.mrb[2].mxu0 }
 0x1fc   : > { %v893_v19 = vpop.f32.mrb[3].mxu0  ;;  %v559_v20 = vsel %vm558_vm2, %v553_v18, -inf }
 0x1fd   : > { %560 = vmax.xlane.f32.xlu0 %v559_v20 }
 0x28a   : > { %v561_v23 = vpop.xlane.xlu0 %560 }
 0x28b   : > { %v562_v24 = vmax.f32 %v557_v22, %v561_v23 }
 0x28d   : > { %v563_v25 = vsub.f32 %v557_v22, %v562_v24  ;;  %664 = vst.msk [vmem:[#allocation4] sm:$0xff] %vm359_vm1, %v562_v24  ;;  %568 = vperm.xlu0 %1015, %v562_v24  }
 0x28f   : > { %v564_v30 = vmul.f32 1.442695, %v563_v25 }
 0x30c   : > { %v569_v26 = vpop.permute.xlu0 %568 }
 0x30d   : > { %v571_v27 = vsub.f32 %v553_v18, %v569_v26 }
 0x30f   : > { %v572_v28 = vmul.f32 1.442695, %v571_v27 }
 0x311   : > { %1017 = vpow2.f32 %v572_v28 }
 0x312   : > { %1019 = vpow2.f32 %v564_v30 }
 0x31b   : > { %v1018_v12 = vpop.eup %1017 }
 0x31c   : > { %897 = vmatmul.mubr.msk.f32.vlgmr.msra.gmra.mrb[2].mxu1 %vm558_vm2, %v1018_v12  ;;  %v576_v29 = vsel %vm558_vm2, %v1018_v12, 0.0  ;;  %v1020_v31 = vpop.eup %1019 }
 0x31d   : > { %577 = vadd.xlane.f32.xlu1 %v576_v29  ;;  %v575_v33 = vmul.f32 %v1020_v31, %v574_v32 }
 0x32e   : > { %585 = vperm.xlu1 %1016, %v1020_v31  }
 0x3aa   : > { %v578_v34 = vpop.xlane.xlu1 %577 }
 0x3ab   : > { %v579_v35 = vadd.f32 %v578_v34, %v575_v33 }
 0x3ad   : > { %581 = vst.msk [vmem:[#allocation5] sm:$0xff] %vm359_vm1, %v579_v35 }
 0x3ae   : > { %v586_v40 = vpop.permute.xlu1 %585 }
 0x3af   : > { %v588_v41 = vmul.f32 0.0, %v586_v40 }
 0x3b4   : > { %v668_v36 = vld [vmem:[#allocation5] sm:$0xff] }
 0x3b5   : > { %1021 = vrcp.f32 %v668_v36 }
 0x3bf   : > { %v1022_v37 = vpop.eup %1021 }
 0x3c0   : > { %673 = vperm.xlu1 %1016, %v1022_v37  }
 0x3ef   : > { %v658_v38 = vpop.f32.mrb[2].mxu1 }
 0x3f0   : > { %v898_v39 = vpop.f32.mrb[3].mxu1  ;;  %v662_v42 = vadd.f32 %v658_v38, %v588_v41 }
 0x43f   : > { %v674_v43 = vpop.permute.xlu1 %673 }
 0x440   : > { %v676_v44 = vmul.f32 %v674_v43, %v662_v42 }
 0x442   : > { %677 = vst [vmem:[%s248_s6] sm:$0xff] %v676_v44 }
 0x443   : > { %1036 = shalt.err (!%p1033_p5)
}
 0x444   : > { %s1037_s24 = scalar_lea.hbm %s1383_s10, 128  ;;  %s1041_s30 = scalar_lea.hbm %s1434_s4, 256 }
 0x445   : > { %p1038_p6 = scmp.ne.s32.totalorder %s1383_s10, %s1037_s24  ;;  %p1042_p10 = scmp.lt.u32.totalorder %s1383_s10, %s1434_s4 }
 0x446   : > { %p1043_p11 = scmp.lt.u32.totalorder %s1041_s30, %s1037_s24  ;;  %p1045_p13 = scmp.lt.u32.totalorder %s1037_s24, %s1383_s10 }
 0x447   : > { %p1039_p7 = pnand %p1038_p6, %p1174_p4 }
 0x448   : > { %p1044_p12 = por %p1043_p11, %p1042_p10 }
 0x449   : > { %p1040_p9 = pneg %p1039_p7 }
 0x44a   : > { %p1046_p0 = por %p1045_p13, %p1044_p12 }
 0x44c   : > { %p1047_p1 = pnand %p1046_p0, %p1040_p9 }
 0x44e   : > { %1050 = shalt.err (!%p1047_p1)
}
 0x44f   : > { %955 = dma.vmem_to_hbm [thread:$0]  (%p1174_p4), %s1385_s7, 128, %s1383_s10, %s679_s11  }
 0x450 PF: > { %p961_p2 = scmp.ge.s32.totalorder %s1101_s20, 2  ;;  %s705_s5 = sand.u32 1, %s1081_s15  }
 0x451   : > { %s706_s6 = scalar_lea.sflag [#allocation8], %s705_s5 }
 0x452   : > { %p958_p3 = pnand %p961_p2, %p1181_p8 }
 0x454   : > { %1076 = dma.done.wait (!%p958_p3), %s706_s6, 128  }
 0x455   : > { %1078 = vsyncadd (!%p958_p3), %s706_s6, 4294967168  ;;  %s17_s20 = sadd.s32 1, %s1101_s20   ;;  %s1437_s15 = smov %s1085_s16 }
 0x456   : > { %p14_p5 = scmp.ge.s32.totalorder %s17_s20, 4   ;;  %s1438_s16 = smov %s1089_s17 }
 0x457   : > { %s1439_s17 = smov %s1187_s28  ;;  %s1440_s18 = smov %s1097_s19 }
 0x458   : > { %s1441_s19 = smov %s1443_s23  ;;  %16 = sbr.rel (!%p14_p5) target bundleno = 4 (0x4), region = 88 }
 0x45f   :  { %711 = vsyncpa [#allocation8], 1 }
 0x460   :  { %713 = vsyncpa [#allocation8 + $0x1], 1 }

</bundles_post_ra>
